<compile_context>
chip_gen: v7x
topology: tpu7x:2x2x1
jax: 0.10.0
libtpu: 0.0.40
codegen_flags: <defaults>
</compile_context>

<pallas_src>
import functools

import jax
import jax.numpy as jnp
from jax.experimental import pallas as pl
from jax.experimental.pallas import tpu as pltpu


def _round_up(x, m):
    return (x + m - 1) // m * m


# ---------------------------------------------------------------------------
# Fused kernel: pool + gate MLP + scale, one sample per grid step.
#   x_ref : (C, HW)   one sample's feature map
#   w1t   : (Cin, Cout) = w1.T ;  b1_row : (1, C) ;  w2 : (Cout, Cin) ; b2_col : (C, 1)
#   o_ref : (C, HW)
# ---------------------------------------------------------------------------
def _fused_kernel(x_ref, w1t_ref, b1_ref, w2_ref, b2_ref, o_ref, *, inv_hw):
    xf = x_ref[...].astype(jnp.float32)                             # (C, HW)
    att = jnp.sum(xf, axis=1, keepdims=True) * inv_hw               # (C, 1)

    # Layer 1: h[co] = relu(sum_ci w1[co,ci] * att[ci] + b1[co])  -> row (1, C)
    w1t = w1t_ref[...].astype(jnp.float32)                          # (Cin, Cout)
    h = jnp.sum(w1t * att, axis=0, keepdims=True) + b1_ref[...].astype(jnp.float32)
    h = jnp.maximum(h, 0.0)                                          # (1, C)

    # Layer 2: g[co] = sigmoid(sum_ci w2[co,ci] * h[ci] + b2[co]) -> col (C, 1)
    w2 = w2_ref[...].astype(jnp.float32)                            # (Cout, Cin)
    z = jnp.sum(w2 * h, axis=1, keepdims=True) + b2_ref[...].astype(jnp.float32)
    g = 1.0 / (1.0 + jnp.exp(-z))                                    # (C, 1)

    o_ref[...] = (g * xf).astype(o_ref.dtype)


# ---------------------------------------------------------------------------
# Fallback kernel 1: global average pool over the spatial axis (tiled f32
# reduction). Ragged H*W tail is masked in-kernel; no host-side padding.
# ---------------------------------------------------------------------------
def _pool_kernel(x_ref, o_ref, acc_ref, *, hw, inv_hw):
    j = pl.program_id(1)

    @pl.when(j == 0)
    def _init():
        acc_ref[...] = jnp.zeros_like(acc_ref)

    tl = x_ref.shape[1]
    col = j * tl + jax.lax.broadcasted_iota(jnp.int32, x_ref.shape, 1)
    xf = jnp.where(col < hw, x_ref[...].astype(jnp.float32), 0.0)
    acc_ref[...] += jnp.sum(xf, axis=1, keepdims=True)

    @pl.when(j == pl.num_programs(1) - 1)
    def _finalize():
        o_ref[...] = acc_ref[...] * inv_hw


# ---------------------------------------------------------------------------
# Fallback kernel 2: broadcast scale — out[r, l] = g[r] * x[r, l] (mem bound).
# ---------------------------------------------------------------------------
def _scale_kernel(g_ref, x_ref, o_ref):
    o_ref[...] = (x_ref[...].astype(jnp.float32) * g_ref[...]).astype(o_ref.dtype)


def attention_forward(fs, w1, b1, w2, b2):
    """fs: (N, C, H, W) NCHW (PyTorch convention).
    w1, w2: (C, C) 1x1-conv weights (out, in); b1, b2: (C, 1) biases."""
    N, C, H, W = fs.shape
    HW = H * W
    R = N * C
    inv_hw = 1.0 / HW

    # ---------- primary path: fused per-sample kernel ----------------------
    # Per-sample f32 slab; with double-buffered in/out + f32 temporaries this
    # budget keeps the working set well under v7x's 64 MiB VMEM.
    slab_f32 = C * HW * 4
    if slab_f32 <= 4 * 1024 * 1024:
        x3d = fs.reshape(N, C, HW)              # contiguous view, no HBM pass
        w1t = jnp.transpose(w1)                 # (Cin, Cout), tiny
        b1_row = b1.reshape(1, C)
        b2_col = b2.reshape(C, 1)

        out3d = pl.pallas_call(
            functools.partial(_fused_kernel, inv_hw=inv_hw),
            out_shape=jax.ShapeDtypeStruct((N, C, HW), fs.dtype),
            grid_spec=pltpu.PrefetchScalarGridSpec(
                num_scalar_prefetch=0,
                grid=(N,),
                in_specs=[
                    pl.BlockSpec((None, C, HW), lambda n: (n, 0, 0)),
                    pl.BlockSpec((C, C), lambda n: (0, 0)),
                    pl.BlockSpec((1, C), lambda n: (0, 0)),
                    pl.BlockSpec((C, C), lambda n: (0, 0)),
                    pl.BlockSpec((C, 1), lambda n: (0, 0)),
                ],
                out_specs=pl.BlockSpec((None, C, HW), lambda n: (n, 0, 0)),
            ),
            compiler_params=pltpu.CompilerParams(
                dimension_semantics=("parallel",),
                vmem_limit_bytes=48 * 1024 * 1024,
            ),
        )(x3d, w1t, b1_row, w2, b2_col)
        return out3d.reshape(N, C, H, W)

    # ---------- fallback: two-pass tiled path (huge samples) ---------------
    x2d = fs.reshape(R, HW)                     # contiguous view, no HBM pass
    # Lane-dense tiles ~4 MiB per f32 buffer; clamp to (8,128)-rounded extents.
    tl = min(2048, _round_up(HW, 128))
    tr = min(512, _round_up(R, 8))
    grid = (pl.cdiv(R, tr), pl.cdiv(HW, tl))

    # pass 1: pooled means (no padding; ragged tail masked in-kernel)
    pooled = pl.pallas_call(
        functools.partial(_pool_kernel, hw=HW, inv_hw=inv_hw),
        out_shape=jax.ShapeDtypeStruct((R, 1), jnp.float32),
        grid_spec=pltpu.PrefetchScalarGridSpec(
            num_scalar_prefetch=0,
            grid=grid,
            in_specs=[pl.BlockSpec((tr, tl), lambda i, j: (i, j))],
            out_specs=pl.BlockSpec((tr, 1), lambda i, j: (i, 0)),
            scratch_shapes=[pltpu.VMEM((tr, 1), jnp.float32)],
        ),
        compiler_params=pltpu.CompilerParams(
            dimension_semantics=("parallel", "arbitrary"),
            vmem_limit_bytes=48 * 1024 * 1024,
        ),
    )(x2d)

    # gate: one batched (N,C)x(C,C) chain in plain JAX (hoisted, tiny)
    att = pooled[:, 0].reshape(N, C)
    h = jnp.maximum(att @ w1.astype(jnp.float32).T + b1[:, 0].astype(jnp.float32), 0.0)
    g = jax.nn.sigmoid(h @ w2.astype(jnp.float32).T + b2[:, 0].astype(jnp.float32))
    g2d = g.reshape(R, 1)

    # pass 2: memory-bound broadcast multiply (OOB writes discarded by Pallas)
    out2d = pl.pallas_call(
        _scale_kernel,
        out_shape=jax.ShapeDtypeStruct((R, HW), fs.dtype),
        grid_spec=pltpu.PrefetchScalarGridSpec(
            num_scalar_prefetch=0,
            grid=grid,
            in_specs=[
                pl.BlockSpec((tr, 1), lambda i, j: (i, 0)),
                pl.BlockSpec((tr, tl), lambda i, j: (i, j)),
            ],
            out_specs=pl.BlockSpec((tr, tl), lambda i, j: (i, j)),
        ),
        compiler_params=pltpu.CompilerParams(
            dimension_semantics=("parallel", "parallel"),
            vmem_limit_bytes=48 * 1024 * 1024,
        ),
    )(g2d, x2d)

    return out2d.reshape(N, C, H, W)


def attention_reference(fs, w1, b1, w2, b2):
    """Pure-JAX reference mirroring the PyTorch forward (eval mode)."""
    att = jnp.mean(fs, axis=(2, 3))                          # (N, C)
    h = jnp.maximum(att @ w1.T + b1[:, 0], 0.0)              # (N, C)
    g = jax.nn.sigmoid(h @ w2.T + b2[:, 0])                  # (N, C)
    return g[:, :, None, None] * fs


if __name__ == "__main__":
    N, C, H, W = 2, 4, 16, 16

    key = jax.random.PRNGKey(0)
    k_x, k_w1, k_b1, k_w2, k_b2 = jax.random.split(key, 5)

    fs = jax.random.normal(k_x, (N, C, H, W), dtype=jnp.float32)

    # 1x1 conv params: PyTorch weight shape (C_out, C_in, 1, 1) -> (C_out, C_in)
    bound = 1.0 / jnp.sqrt(C)
    w1 = jax.random.uniform(k_w1, (C, C), jnp.float32, -bound, bound)
    b1 = jax.random.uniform(k_b1, (C, 1), jnp.float32, -bound, bound)
    w2 = jax.random.uniform(k_w2, (C, C), jnp.float32, -bound, bound)
    b2 = jax.random.uniform(k_b2, (C, 1), jnp.float32, -bound, bound)

    fwd = jax.jit(attention_forward)
    out = fwd(fs, w1, b1, w2, b2)
    jax.block_until_ready(out)

    ref = attention_reference(fs, w1, b1, w2, b2)
    assert out.shape == (N, C, H, W)
    assert jnp.allclose(out, ref, atol=1e-5, rtol=1e-5), "mismatch vs JAX reference"

    print("KERNEL_OK")
</pallas_src>

<mosaic_0001>
module attributes {stable_mosaic.version = 11 : i64} {
  func.func @_fused_kernel(%arg0: i32, %arg1: memref<1x4x256xf32, #tpu.memory_space<vmem>>, %arg2: memref<4x4xf32, #tpu.memory_space<vmem>>, %arg3: memref<1x4xf32, #tpu.memory_space<vmem>>, %arg4: memref<4x4xf32, #tpu.memory_space<vmem>>, %arg5: memref<4x1xf32, #tpu.memory_space<vmem>>, %arg6: memref<1x4x256xf32, #tpu.memory_space<vmem>>) attributes {dimension_semantics = [#tpu.dimension_semantics<parallel>], iteration_bounds = array<i64: 2>, scalar_prefetch = 0 : i64, scratch_operands = 0 : i64, tpu.core_type = #tpu.core_type<tc>, window_params = [{transform_indices = @transform_0, window_bounds = array<i64: 1, 4, 256>}, {pipeline_mode = #tpu.pipeline_mode<synchronous>, transform_indices = @transform_1, window_bounds = array<i64: 4, 4>}, {pipeline_mode = #tpu.pipeline_mode<synchronous>, transform_indices = @transform_2, window_bounds = array<i64: 1, 4>}, {pipeline_mode = #tpu.pipeline_mode<synchronous>, transform_indices = @transform_3, window_bounds = array<i64: 4, 4>}, {pipeline_mode = #tpu.pipeline_mode<synchronous>, transform_indices = @transform_4, window_bounds = array<i64: 4, 1>}, {transform_indices = @transform_5, window_bounds = array<i64: 1, 4, 256>}]} {
    %c0 = arith.constant 0 : index
    %c0_0 = arith.constant 0 : index
    %c0_1 = arith.constant 0 : index
    %0 = vector.load %arg1[%c0, %c0_0, %c0_1] : memref<1x4x256xf32, #tpu.memory_space<vmem>>, vector<1x4x256xf32>
    %1 = vector.shape_cast %0 : vector<1x4x256xf32> to vector<4x256xf32>
    %cst = arith.constant dense<0.000000e+00> : vector<4xf32>
    %2 = vector.multi_reduction <add>, %1, %cst [1] : vector<4x256xf32> to vector<4xf32>
    %3 = vector.shape_cast %2 : vector<4xf32> to vector<4x1xf32>
    %cst_2 = arith.constant 3.906250e-03 : f32
    %4 = vector.broadcast %cst_2 : f32 to vector<4x1xf32>
    %5 = arith.mulf %3, %4 : vector<4x1xf32>
    %c0_3 = arith.constant 0 : index
    %c0_4 = arith.constant 0 : index
    %6 = vector.load %arg2[%c0_3, %c0_4] : memref<4x4xf32, #tpu.memory_space<vmem>>, vector<4x4xf32>
    %7 = vector.broadcast %5 : vector<4x1xf32> to vector<4x4xf32>
    %8 = arith.mulf %6, %7 : vector<4x4xf32>
    %cst_5 = arith.constant dense<0.000000e+00> : vector<4xf32>
    %9 = vector.multi_reduction <add>, %8, %cst_5 [0] : vector<4x4xf32> to vector<4xf32>
    %10 = vector.shape_cast %9 : vector<4xf32> to vector<1x4xf32>
    %c0_6 = arith.constant 0 : index
    %c0_7 = arith.constant 0 : index
    %11 = vector.load %arg3[%c0_6, %c0_7] : memref<1x4xf32, #tpu.memory_space<vmem>>, vector<1x4xf32>
    %12 = arith.addf %10, %11 : vector<1x4xf32>
    %cst_8 = arith.constant 0.000000e+00 : f32
    %13 = vector.broadcast %cst_8 : f32 to vector<1x4xf32>
    %14 = arith.maximumf %12, %13 : vector<1x4xf32>
    %c0_9 = arith.constant 0 : index
    %c0_10 = arith.constant 0 : index
    %15 = vector.load %arg4[%c0_9, %c0_10] : memref<4x4xf32, #tpu.memory_space<vmem>>, vector<4x4xf32>
    %16 = vector.broadcast %14 : vector<1x4xf32> to vector<4x4xf32>
    %17 = arith.mulf %15, %16 : vector<4x4xf32>
    %cst_11 = arith.constant dense<0.000000e+00> : vector<4xf32>
    %18 = vector.multi_reduction <add>, %17, %cst_11 [1] : vector<4x4xf32> to vector<4xf32>
    %19 = vector.shape_cast %18 : vector<4xf32> to vector<4x1xf32>
    %c0_12 = arith.constant 0 : index
    %c0_13 = arith.constant 0 : index
    %20 = vector.load %arg5[%c0_12, %c0_13] : memref<4x1xf32, #tpu.memory_space<vmem>>, vector<4x1xf32>
    %21 = arith.addf %19, %20 : vector<4x1xf32>
    %cst_14 = arith.constant 0.000000e+00 : f32
    %22 = vector.broadcast %cst_14 : f32 to vector<4x1xf32>
    %23 = arith.subf %22, %21 : vector<4x1xf32>
    %24 = math.exp %23 : vector<4x1xf32>
    %cst_15 = arith.constant 1.000000e+00 : f32
    %25 = vector.broadcast %cst_15 : f32 to vector<4x1xf32>
    %26 = arith.addf %25, %24 : vector<4x1xf32>
    %cst_16 = arith.constant 1.000000e+00 : f32
    %27 = vector.broadcast %cst_16 : f32 to vector<4x1xf32>
    %28 = arith.divf %27, %26 : vector<4x1xf32>
    %29 = vector.broadcast %28 : vector<4x1xf32> to vector<4x256xf32>
    %30 = arith.mulf %29, %1 : vector<4x256xf32>
    %c0_17 = arith.constant 0 : index
    %c0_18 = arith.constant 0 : index
    %c0_19 = arith.constant 0 : index
    %31 = vector.load %arg6[%c0_17, %c0_18, %c0_19] : memref<1x4x256xf32, #tpu.memory_space<vmem>>, vector<1x4x256xf32>
    %32 = vector.shape_cast %31 : vector<1x4x256xf32> to vector<4x256xf32>
    %33 = vector.shape_cast %30 : vector<4x256xf32> to vector<1x4x256xf32>
    tpu.vector_store %arg6[%c0_17, %c0_18, %c0_19], %33 {strides = array<i32>} : memref<1x4x256xf32, #tpu.memory_space<vmem>>, vector<1x4x256xf32>,
    return
  }
  func.func @transform_0(%arg0: i32) -> (i32, i32, i32) {
    %c0_i32 = arith.constant 0 : i32
    %c0_i32_0 = arith.constant 0 : i32
    %c0_i32_1 = arith.constant 0 : i32
    return %arg0, %c0_i32, %c0_i32_0 : i32, i32, i32
  }
  func.func @transform_1(%arg0: i32) -> (i32, i32) {
    %c0_i32 = arith.constant 0 : i32
    %c0_i32_0 = arith.constant 0 : i32
    %c0_i32_1 = arith.constant 0 : i32
    return %c0_i32, %c0_i32_0 : i32, i32
  }
  func.func @transform_2(%arg0: i32) -> (i32, i32) {
    %c0_i32 = arith.constant 0 : i32
    %c0_i32_0 = arith.constant 0 : i32
    %c0_i32_1 = arith.constant 0 : i32
    return %c0_i32, %c0_i32_0 : i32, i32
  }
  func.func @transform_3(%arg0: i32) -> (i32, i32) {
    %c0_i32 = arith.constant 0 : i32
    %c0_i32_0 = arith.constant 0 : i32
    %c0_i32_1 = arith.constant 0 : i32
    return %c0_i32, %c0_i32_0 : i32, i32
  }
  func.func @transform_4(%arg0: i32) -> (i32, i32) {
    %c0_i32 = arith.constant 0 : i32
    %c0_i32_0 = arith.constant 0 : i32
    %c0_i32_1 = arith.constant 0 : i32
    return %c0_i32, %c0_i32_0 : i32, i32
  }
  func.func @transform_5(%arg0: i32) -> (i32, i32, i32) {
    %c0_i32 = arith.constant 0 : i32
    %c0_i32_0 = arith.constant 0 : i32
    %c0_i32_1 = arith.constant 0 : i32
    return %arg0, %c0_i32, %c0_i32_0 : i32, i32, i32
  }
}

</mosaic_0001>

<bundles_post_ra>
// kernel: attention_forward.1
= control target key start
LH: loop header
LB: loop body
LE: loop exit
PB: predicated region body
PF: predicated region fallthrough
CT: control target
= control target key end

     0   :  { %s401_s18 = smov 0   ;;  %s439_s0 = inlined_call_operand.vmem [shape: f32[2,4,256], index: 0, kind: input, shape index: {}]   ;;  %s440_s1 = inlined_call_operand.vmem [shape: f32[4,4], index: 1, kind: input, shape index: {}]   ;;  %s441_s2 = inlined_call_operand.vmem [shape: f32[1,4], index: 2, kind: input, shape index: {}]   ;;  %s442_s3 = inlined_call_operand.vmem [shape: f32[4,4], index: 3, kind: input, shape index: {}]   ;;  %s443_s4 = inlined_call_operand.vmem [shape: f32[4,1], index: 4, kind: input, shape index: {}]   ;;  %s444_s5 = inlined_call_operand.vmem [shape: f32[2,4,256], index: 5, kind: output, shape index: {}]  }
   0x1 LB: > { %s333_s19 = sadd.s32 4294967295, %s368_s18   ;;  %p337_p0 = scmp.ge.s32.totalorder %s368_s18, 1  ;;  %s368_s18 = sphi %s401_s18, %s15_s18  }
   0x2   : > { %p187_p1 = scmp.lt.s32.totalorder %s368_s18, 3 }
   0x4   : > { %p188_p2 = pnand %p337_p0, %p187_p1 }
   0x5   : > { %p215_p3 = scmp.lt.s32.totalorder (!%p188_p2), %s333_s19, 1  ;;  %vm229_vm0 = vcmask (!%p188_p2), 1043456   ;;  %v236_v5 = vld [vmem:[%s440_s1] sm:$0xf] (!%p188_p2)  ;;  %vm238_vm1 = vcmask (!%p188_p2), 27648   ;;  %v250_v13 = vlaneseq (!%p188_p2)  ;;  %v370_v26 = vmov (!%p188_p2), 0  }
   0x6   : > { %191 = sbr.rel (%p188_p2) target bundleno = 495 (0x1ef), region = 40  ;;  %v246_v17 = vld [vmem:[%s441_s2] sm:$0x1] (!%p188_p2)  ;;  %355 = vset.pattern.permute.xlu1 (!%p188_p2), %v370_v26  ;;  %356 = vset.pattern.permute.xlu0 (!%p188_p2), %v370_v26 }
   0x7   : > { %v251_v16 = vshrl.u32 (!%p188_p2), %v250_v13, 7  ;;  %v249_v22 = vld [vmem:[%s442_s3] sm:$0xf] (!%p188_p2) }
   0x8   : > { %v258_v27 = vld [vmem:[%s443_s4] sm:$0xf] (!%p188_p2) }
   0x9   : > { %v252_v20 = vsub.s32 (!%p188_p2), 0, %v251_v16 }
   0xd   : > { %s446_s19 = smov (!%p215_p3, %s333_s19), 1 }
   0xe   : > { %s344_s20 = sshll.u32 %s446_s19, 3 }
   0xf   : > { %s219_s23 = scalar_lea.vmem %s439_s0, %s344_s20  ;;  %s224_s9 = scalar_lea.vmem %s444_s5, %s344_s20 }
  0x10   : > { %v225_v0 = vld [vmem:[%s219_s23] sm:$0xff] }
  0x11   : > { %v227_v1 = vcombine.high %v225_v0, %v225_v0  ;;  %v230_v2 = vsel %vm229_vm0, %v225_v0, 0.0 }
  0x13   : > { %v231_v3 = vsel %vm229_vm0, %v227_v1, 0.0 }
  0x14   : > { %v232_v4 = vadd.f32 %v231_v3, %v230_v2 }
  0x16   : > { %233 = vadd.xlane.f32.xlu0 %v232_v4 }
  0xa3   : > { %v234_v6 = vpop.xlane.xlu0 %233 }
  0xa4   : > { %v235_v7 = vmul.f32 0.00390625, %v234_v6 }
  0xa6   : > { %v237_v8 = vmul.f32 %v236_v5, %v235_v7 }
  0xa8   : > { %v239_v9 = vsel %vm238_vm1, %v237_v8, 0.0 }
  0xa9   : > { %v240_v10 = vrot.slane %v239_v9, 4 }
  0xab   : > { %v241_v11 = vadd.f32 %v240_v10, %v239_v9 }
  0xad   : > { %v242_v12 = vrot.slane %v241_v11, 2 }
  0xaf   : > { %v243_v14 = vadd.f32 %v242_v12, %v241_v11 }
  0xb1   : > { %v244_v15 = vrot.slane %v243_v14, 1 }
  0xb3   : > { %v245_v18 = vadd.f32 %v244_v15, %v243_v14 }
  0xb5   : > { %v247_v19 = vadd.f32 %v246_v17, %v245_v18 }
  0xb7   : > { %v248_v21 = vmax.f32 %v247_v19, 0.0 }
  0xb9   : > { %v253_v23 = vrot.slane %v248_v21, %v252_v20 }
  0xbb   : > { %v254_v24 = vmul.f32 %v253_v23, %v249_v22 }
  0xbd   : > { %v255_v25 = vsel %vm238_vm1, %v254_v24, 0.0 }
  0xbe   : > { %256 = vadd.xlane.f32.xlu0 %v255_v25 }
 0x14b   : > { %v257_v28 = vpop.xlane.xlu0 %256 }
 0x14c   : > { %v259_v29 = vadd.f32 %v258_v27, %v257_v28 }
 0x14e   : > { %v260_v30 = vsub.f32 0.0, %v259_v29 }
 0x150   : > { %v261_v31 = vmul.f32 1.442695, %v260_v30 }
 0x152   : > { %358 = vpow2.f32 %v261_v31 }
 0x15c   : > { %v359_v32 = vpop.eup %358 }
 0x15d   : > { %v263_v33 = vadd.f32 1.0, %v359_v32 }
 0x15f   : > { %360 = vrcp.f32 %v263_v33 }
 0x169   : > { %v361_v34 = vpop.eup %360 }
 0x16a   : > { %268 = vperm.xlu1 %355, %v361_v34  }
 0x1e9   : > { %v269_v35 = vpop.permute.xlu1 %268 }
 0x1ea   : > { %v271_v36 = vmul.f32 %v269_v35, %v225_v0  ;;  %v272_v37 = vmul.f32 %v269_v35, %v227_v1 }
 0x1ec   : > { %v275_v38 = vcombine.low %v271_v36, %v272_v37 }
 0x1ee   : > { %277 = vst [vmem:[%s224_s9] sm:$0xff] %v275_v38 }
 0x1ef PF: > { %s15_s18 = sadd.s32 1, %s368_s18  }
 0x1f0   : > { %p12_p4 = scmp.ge.s32.totalorder %s15_s18, 4  }
 0x1f2   :  { %14 = sbr.rel (!%p12_p4) target bundleno = 1 (0x1), region = 70 }

</bundles_post_ra>
